<compile_context>
chip_gen: v7x
topology: tpu7x:2x2x1
jax: 0.10.0
libtpu: 0.0.40
codegen_flags: <defaults>
</compile_context>

<pallas_src>
import jax
import jax.numpy as jnp
from jax import lax
from jax.experimental import pallas as pl
from jax.experimental.pallas import tpu as pltpu

_NEG_LARGE = -1e30                       # finite "-inf"; exp underflows to 0 in f32
_VMEM_LIMIT_BYTES = 48 * 1024 * 1024     # safe on v5e/v6e (128 MiB phys) and v7x (64 MiB)
_RESIDENT_BUDGET_BYTES = 40 * 1024 * 1024  # resident-z cap, double buffering counted


def _round_up(x: int, m: int) -> int:
    return (x + m - 1) // m * m


# --------------------------------------------------------------------------------------
# Resident-z kernel: grid = (row_tiles,), z lives whole in VMEM, column loop in-kernel.
# --------------------------------------------------------------------------------------
def _make_resident_kernel(inv_t: float, n_valid: int, n_pad: int,
                          tile_r: int, tile_c: int):
    n_chunks = n_pad // tile_c
    has_pad = n_pad != n_valid
    pad_count = float(n_pad - n_valid)

    def kernel(z_ref, loss_ref):
        i = pl.program_id(0)
        r0 = pl.multiple_of(i * tile_r, tile_r)
        zr = z_ref[pl.ds(r0, tile_r), :]                          # (tile_r, d_pad)

        def body(k, carry):
            m, l, t = carry
            c0 = pl.multiple_of(k * tile_c, tile_c)
            zc = z_ref[pl.ds(c0, tile_c), :]                      # (tile_c, d_pad)
            # s[j, i] = <z_c[j], z_r[i]> / T ; f32 MXU accumulation, lane axis = loss row.
            s = lax.dot_general(zc, zr, (((1,), (1,)), ((), ())),
                                preferred_element_type=jnp.float32) * inv_t
            # Target logit sim[:, 0] = <z_0, z_i>/T lives in the k == 0 chunk (row 0).
            t = jnp.where(k == 0, s[0:1, :], t)
            m_new = jnp.maximum(m, jnp.max(s, axis=0, keepdims=True))
            p = jnp.exp(s - m_new)
            l = jnp.exp(m - m_new) * l + jnp.sum(p, axis=0, keepdims=True)
            return m_new, l, t

        init = (jnp.full((1, tile_r), _NEG_LARGE, jnp.float32),   # running max
                jnp.zeros((1, tile_r), jnp.float32),              # running sum
                jnp.zeros((1, tile_r), jnp.float32))              # target logit
        m, l, t = lax.fori_loop(0, n_chunks, body, init)

        if has_pad:
            # Padded rows of z are exactly 0, so each padded "other sample" contributed
            # exactly exp(0 - m) to l.  Remove them once here -> no per-tile masking.
            l = l - pad_count * jnp.exp(-m)
        per_row = jnp.log(l) + m - t                              # (1, tile_r), lane-dense
        if has_pad:
            ids = lax.broadcasted_iota(jnp.int32, (1, tile_r), 1) + i * tile_r
            per_row = jnp.where(ids < n_valid, per_row, 0.0)
        loss_ref[...] = per_row

    return kernel


# --------------------------------------------------------------------------------------
# Streamed fallback: grid = (row_tiles, col_tiles), flash-style online logsumexp with
# VMEM-resident accumulators (col axis innermost, "arbitrary").
# --------------------------------------------------------------------------------------
def _make_streamed_kernel(inv_t: float, n_valid: int, n_pad: int,
                          tile_r: int, tile_c: int):
    has_pad = n_pad != n_valid
    pad_count = float(n_pad - n_valid)

    def kernel(zr_ref, zc_ref, loss_ref, m_s, l_s, t_s):
        i = pl.program_id(0)
        k = pl.program_id(1)
        nk = pl.num_programs(1)

        s = lax.dot_general(zc_ref[...], zr_ref[...], (((1,), (1,)), ((), ())),
                            preferred_element_type=jnp.float32) * inv_t   # (tile_c, tile_r)

        @pl.when(k == 0)
        def _init():
            m_s[...] = jnp.full((1, tile_r), _NEG_LARGE, jnp.float32)
            l_s[...] = jnp.zeros((1, tile_r), jnp.float32)
            t_s[...] = s[0:1, :]                    # target logit sim[:, 0]

        m_prev = m_s[...]
        m_new = jnp.maximum(m_prev, jnp.max(s, axis=0, keepdims=True))
        p = jnp.exp(s - m_new)
        l_s[...] = jnp.exp(m_prev - m_new) * l_s[...] + jnp.sum(p, axis=0, keepdims=True)
        m_s[...] = m_new

        @pl.when(k == nk - 1)
        def _finalize():
            m = m_s[...]
            l = l_s[...]
            if has_pad:
                l = l - pad_count * jnp.exp(-m)     # remove exact zero-padding contribution
            per_row = jnp.log(l) + m - t_s[...]
            if has_pad:
                ids = lax.broadcasted_iota(jnp.int32, (1, tile_r), 1) + i * tile_r
                per_row = jnp.where(ids < n_valid, per_row, 0.0)
            loss_ref[...] = per_row

    return kernel


# --------------------------------------------------------------------------------------
# Wrapper
# --------------------------------------------------------------------------------------
def constructive_learning_loss(image_org, image_aug, temperature, *,
                               matmul_dtype=jnp.bfloat16,
                               vmem_budget_bytes=_RESIDENT_BUDGET_BYTES):
    """Forward pass equivalent to ConstructiveLearning(temperature, device)(org, aug).

    matmul_dtype: dtype of the MXU operands (bf16 default; softmax math is always f32).
    vmem_budget_bytes: budget used to decide resident-z vs streamed path.
    """
    assert image_org.ndim == 2 and image_org.shape == image_aug.shape
    B, D = image_org.shape
    n = 2 * B
    inv_t = 1.0 / float(temperature)

    md = jnp.dtype(matmul_dtype)
    itemsize = md.itemsize
    # z = cat([aug, org]) once, cast matmul operands down (accumulation stays f32).
    z = jnp.concatenate([image_aug, image_org], axis=0).astype(md)

    d_pad = _round_up(D, 128)                     # lane-friendly feature dim
    sub_pack = max(8, 32 // itemsize)             # sublane pack: 8 f32 / 16 bf16 / 32 int8

    # ---- resident-path tiling candidate -------------------------------------------
    if n > 256:
        n_res = _round_up(n, 256)
        tile_r_res = 256                          # -> >= 2 row tiles: feeds both v7x cores
    else:
        n_res = _round_up(n, sub_pack)
        # Split a single big tile in two so v7x megacore still gets 2 row tiles.
        tile_r_res = n_res // 2 if n_res >= 256 else n_res
    z_res_bytes = n_res * d_pad * itemsize
    resident = (2 * z_res_bytes + 6 * 1024 * 1024) <= vmem_budget_bytes

    if resident:
        n_pad, tile_r = n_res, tile_r_res
        if n_pad % 512 == 0:
            tile_c = 512
        elif n_pad % 256 == 0:
            tile_c = 256
        else:
            tile_c = n_pad
        if n_pad != n or d_pad != D:
            z = jnp.pad(z, ((0, n_pad - n), (0, d_pad - D)))
        gr = n_pad // tile_r

        kernel = _make_resident_kernel(inv_t, n, n_pad, tile_r, tile_c)
        cost = pl.CostEstimate(
            flops=2 * n_pad * n_pad * d_pad,
            transcendentals=n_pad * n_pad,
            bytes_accessed=n_pad * d_pad * itemsize + gr * tile_r * 4)

        per_row = pl.pallas_call(
            kernel,
            out_shape=jax.ShapeDtypeStruct((gr, tile_r), jnp.float32),
            grid_spec=pltpu.PrefetchScalarGridSpec(
                num_scalar_prefetch=0,
                grid=(gr,),
                # Constant block index -> z is DMA'd HBM->VMEM exactly once.
                in_specs=[pl.BlockSpec((n_pad, d_pad), lambda i: (0, 0))],
                out_specs=pl.BlockSpec((1, tile_r), lambda i: (i, 0)),
            ),
            compiler_params=pltpu.CompilerParams(
                dimension_semantics=("parallel",),
                vmem_limit_bytes=_VMEM_LIMIT_BYTES),
            cost_estimate=cost,
        )(z)
    else:
        # Streamed path: large row tile per roofline (2*tile_r/itemsize flops/byte of
        # column re-streaming), shrink only if the double-buffered blocks bust VMEM.
        tile_c = 256
        tile_r = 1024
        while tile_r > 256:
            need = (2 * tile_r * d_pad * itemsize      # row block, 2 buffers
                    + 2 * tile_c * d_pad * itemsize    # col block, 2 buffers
                    + 12 * 1024 * 1024)                # f32 intermediates + slack
            if need <= _VMEM_LIMIT_BYTES:
                break
            tile_r //= 2
        n_pad = _round_up(n, tile_r)                   # tile_c (256) divides tile_r
        if n_pad != n or d_pad != D:
            z = jnp.pad(z, ((0, n_pad - n), (0, d_pad - D)))
        gr, gc = n_pad // tile_r, n_pad // tile_c

        kernel = _make_streamed_kernel(inv_t, n, n_pad, tile_r, tile_c)
        cost = pl.CostEstimate(
            flops=2 * n_pad * n_pad * d_pad,
            transcendentals=n_pad * n_pad,
            bytes_accessed=(gr * tile_r * d_pad * itemsize
                            + gr * gc * tile_c * d_pad * itemsize
                            + gr * tile_r * 4))

        per_row = pl.pallas_call(
            kernel,
            out_shape=jax.ShapeDtypeStruct((gr, tile_r), jnp.float32),
            grid_spec=pltpu.PrefetchScalarGridSpec(
                num_scalar_prefetch=0,
                grid=(gr, gc),
                in_specs=[
                    pl.BlockSpec((tile_r, d_pad), lambda i, k: (i, 0)),   # row tile
                    pl.BlockSpec((tile_c, d_pad), lambda i, k: (k, 0)),   # column tile
                ],
                out_specs=pl.BlockSpec((1, tile_r), lambda i, k: (i, 0)),
                scratch_shapes=[pltpu.VMEM((1, tile_r), jnp.float32),  # running max
                                pltpu.VMEM((1, tile_r), jnp.float32),  # running sum
                                pltpu.VMEM((1, tile_r), jnp.float32)], # target logit
            ),
            compiler_params=pltpu.CompilerParams(
                dimension_semantics=("parallel", "arbitrary"),
                vmem_limit_bytes=_VMEM_LIMIT_BYTES),
            cost_estimate=cost,
        )(z, z)

    # Padded rows were written as exactly 0 inside the kernel.
    return jnp.sum(per_row) / jnp.float32(n)


# --------------------------------------------------------------------------------------
# Pure-JAX reference mirroring the PyTorch semantics (incl. the row reversal).
# --------------------------------------------------------------------------------------
def _reference_loss(image_org, image_aug, temperature, matmul_dtype=jnp.bfloat16,
                    precision=None):
    z = jnp.concatenate([image_aug, image_org], axis=0).astype(matmul_dtype)
    sim = lax.dot_general(z, z, (((1,), (1,)), ((), ())),
                          preferred_element_type=jnp.float32,
                          precision=precision) * (1.0 / float(temperature))
    sim_rev = sim[::-1, :]                         # `sim[~positive_mask]` == row reversal
    lse = jax.nn.logsumexp(sim_rev, axis=-1)
    return jnp.mean(lse - sim_rev[:, 0])


if __name__ == "__main__":
    key = jax.random.PRNGKey(0)
    ks = jax.random.split(key, 4)
    temperature = 0.5

    # 1) Small shape consistent with the module (B embeddings of dim D per view);
    #    bf16 matmul operands, resident-z single-tile path.
    B, D = 8, 32
    org = jax.random.normal(ks[0], (B, D), dtype=jnp.float32)
    aug = jax.random.normal(ks[1], (B, D), dtype=jnp.float32)
    out = jax.block_until_ready(constructive_learning_loss(org, aug, temperature))
    ref = _reference_loss(org, aug, temperature)
    assert jnp.allclose(out, ref, atol=2e-3, rtol=2e-3), (out, ref)

    # 2) Resident path with row padding, several column chunks and >= 2 row tiles
    #    (exercises the fori_loop streaming, pad correction and the "parallel" grid).
    B2, D2 = 300, 72
    org2 = jax.random.normal(ks[2], (B2, D2), dtype=jnp.float32)
    aug2 = jax.random.normal(ks[3], (B2, D2), dtype=jnp.float32)
    out2 = jax.block_until_ready(constructive_learning_loss(org2, aug2, temperature))
    ref2 = _reference_loss(org2, aug2, temperature)
    assert jnp.allclose(out2, ref2, atol=2e-3, rtol=2e-3), (out2, ref2)

    # 3) Streamed fallback (forced with a zero budget) — exercises the 2-D grid,
    #    pl.when init/finalize and the online-logsumexp scratch accumulators.
    out3 = jax.block_until_ready(
        constructive_learning_loss(org2, aug2, temperature, vmem_budget_bytes=0))
    assert jnp.allclose(out3, ref2, atol=2e-3, rtol=2e-3), (out3, ref2)

    # 4) f32-operand path smoke test (module-exact dtype); loose tolerance because the
    #    XLA reference and the Mosaic matmul may use different f32 matmul decompositions.
    out4 = jax.block_until_ready(
        constructive_learning_loss(org, aug, temperature, matmul_dtype=jnp.float32))
    ref4 = _reference_loss(org, aug, temperature, matmul_dtype=jnp.float32,
                           precision=lax.Precision.HIGHEST)
    assert jnp.allclose(out4, ref4, atol=0.5, rtol=1e-2), (out4, ref4)

    print("KERNEL_OK")
</pallas_src>

<mosaic_0001>
module attributes {stable_mosaic.version = 11 : i64} {
  func.func @kernel(%arg0: i32, %arg1: memref<16x128xbf16, #tpu.memory_space<vmem>>, %arg2: memref<1x16xf32, #tpu.memory_space<vmem>>) attributes {dimension_semantics = [#tpu.dimension_semantics<parallel>], iteration_bounds = array<i64: 1>, scalar_prefetch = 0 : i64, scratch_operands = 0 : i64, tpu.core_type = #tpu.core_type<tc>, window_params = [{pipeline_mode = #tpu.pipeline_mode<synchronous>, transform_indices = @transform_0, window_bounds = array<i64: 16, 128>}, {transform_indices = @transform_1, window_bounds = array<i64: 1, 16>}]} {
    %c16_i32 = arith.constant 16 : i32
    %0 = arith.muli %arg0, %c16_i32 : i32
    %1 = tpu.assume_multiple %0, 16 : i32
    %2 = arith.index_cast %1 : i32 to index
    %c0 = arith.constant 0 : index
    %3 = vector.load %arg1[%2, %c0] : memref<16x128xbf16, #tpu.memory_space<vmem>>, vector<16x128xbf16>
    %cst = arith.constant -1.000000e+30 : f32
    %4 = vector.broadcast %cst : f32 to vector<1x16xf32>
    %cst_0 = arith.constant 0.000000e+00 : f32
    %5 = vector.broadcast %cst_0 : f32 to vector<1x16xf32>
    %cst_1 = arith.constant 0.000000e+00 : f32
    %6 = vector.broadcast %cst_1 : f32 to vector<1x16xf32>
    %c0_i32 = arith.constant 0 : i32
    %c16_i32_2 = arith.constant 16 : i32
    %7 = arith.muli %c0_i32, %c16_i32_2 : i32
    %8 = tpu.assume_multiple %7, 16 : i32
    %9 = arith.index_cast %8 : i32 to index
    %c0_3 = arith.constant 0 : index
    %10 = vector.load %arg1[%9, %c0_3] : memref<16x128xbf16, #tpu.memory_space<vmem>>, vector<16x128xbf16>
    %cst_4 = arith.constant dense<0.000000e+00> : vector<16x16xf32>
    %11 = tpu.matmul %10, %3, %cst_4 {dimension_numbers = #tpu.dot_dimension_numbers<[1], [1], [0], [0], [0, 0, 1, 0], [], []>} : vector<16x128xbf16>, vector<16x128xbf16>, vector<16x16xf32> -> vector<16x16xf32>
    %cst_5 = arith.constant 2.000000e+00 : f32
    %12 = vector.broadcast %cst_5 : f32 to vector<16x16xf32>
    %13 = arith.mulf %11, %12 : vector<16x16xf32>
    %c0_i32_6 = arith.constant 0 : i32
    %14 = arith.cmpi eq, %c0_i32, %c0_i32_6 : i32
    %15 = vector.extract_strided_slice %13 {offsets = [0, 0], sizes = [1, 16], strides = [1, 1]} : vector<16x16xf32> to vector<1x16xf32>
    %16 = arith.select %14, %15, %6 : vector<1x16xf32>
    %cst_7 = arith.constant dense<0xFF800000> : vector<16xf32>
    %17 = vector.multi_reduction <maximumf>, %13, %cst_7 [0] : vector<16x16xf32> to vector<16xf32>
    %18 = vector.shape_cast %17 : vector<16xf32> to vector<1x16xf32>
    %19 = arith.maximumf %4, %18 : vector<1x16xf32>
    %20 = vector.broadcast %19 : vector<1x16xf32> to vector<16x16xf32>
    %21 = arith.subf %13, %20 : vector<16x16xf32>
    %22 = math.exp %21 : vector<16x16xf32>
    %23 = arith.subf %4, %19 : vector<1x16xf32>
    %24 = math.exp %23 : vector<1x16xf32>
    %25 = arith.mulf %24, %5 : vector<1x16xf32>
    %cst_8 = arith.constant dense<0.000000e+00> : vector<16xf32>
    %26 = vector.multi_reduction <add>, %22, %cst_8 [0] : vector<16x16xf32> to vector<16xf32>
    %27 = vector.shape_cast %26 : vector<16xf32> to vector<1x16xf32>
    %28 = arith.addf %25, %27 : vector<1x16xf32>
    %c1_i32 = arith.constant 1 : i32
    %29 = math.log %28 : vector<1x16xf32>
    %30 = arith.addf %29, %19 : vector<1x16xf32>
    %31 = arith.subf %30, %16 : vector<1x16xf32>
    %c0_9 = arith.constant 0 : index
    %c0_10 = arith.constant 0 : index
    %32 = vector.load %arg2[%c0_9, %c0_10] : memref<1x16xf32, #tpu.memory_space<vmem>>, vector<1x16xf32>
    tpu.vector_store %arg2[%c0_9, %c0_10], %31 {strides = array<i32>} : memref<1x16xf32, #tpu.memory_space<vmem>>, vector<1x16xf32>,
    return
  }
  func.func @transform_0(%arg0: i32) -> (i32, i32) {
    %c0_i32 = arith.constant 0 : i32
    %c0_i32_0 = arith.constant 0 : i32
    %c0_i32_1 = arith.constant 0 : i32
    return %c0_i32, %c0_i32_0 : i32, i32
  }
  func.func @transform_1(%arg0: i32) -> (i32, i32) {
    %c0_i32 = arith.constant 0 : i32
    %c0_i32_0 = arith.constant 0 : i32
    return %arg0, %c0_i32 : i32, i32
  }
}

</mosaic_0001>

<bundles_post_ra>
// kernel: tpu_custom_call.1
= control target key start
LH: loop header
LB: loop body
LE: loop exit
PB: predicated region body
PF: predicated region fallthrough
CT: control target
= control target key end

     0   :  { %6 = vsyncpa [#allocation3], 0  ;;  %s260_s0 = inlined_call_operand.hbm [shape: bf16[16,128], index: 0, kind: input, shape index: {}]   ;;  %s261_s1 = inlined_call_operand.hbm [shape: f32[1,16], index: 1, kind: output, shape index: {}]  }
   0x1   :  { %7 = vsyncpa [#allocation4], 0  ;;  %s216_s6 = smov [#allocation2]   ;;  %s168_s10 = scalar_lea.hbm %s260_s0, 128 }
   0x2   :  { %s13_s7 = sshll.u32 %s216_s6, 4  ;;  %p169_p0 = scmp.ne.s32.totalorder %s260_s0, %s168_s10  ;;  %s14_s7 = int_to_ptr.vmem [resolvable:$true] %s13_s7 }
   0x3   :  { %p172_p1 = scmp.lt.u32.totalorder %s168_s10, %s260_s0 }
   0x5   :  { %p174_p2 = pnand %p172_p1, %p169_p0 }
   0x7   :  { %177 = shalt.err (!%p174_p2)
}
   0x8   :  { %s178_s15 = scalar_lea.vmem %s14_s7, 128  ;;  %p183_p4 = scmp.lt.s32.totalorder %s14_s7, %s14_s7 }
   0x9   :  { %p179_p3 = scmp.ne.s32.totalorder %s14_s7, %s178_s15  ;;  %p184_p5 = scmp.lt.s32.totalorder %s178_s15, %s178_s15 }
   0xb   :  { %p185_p6 = por %p184_p5, %p183_p4 }
   0xd   :  { %p186_p7 = pnand %p185_p6, %p179_p3 }
   0xf   :  { %189 = shalt.err (!%p186_p7)
}
  0x10   :  { %s217_s16 = smov 64   ;;  %s218_s17 = smov 4  }
  0x11   :  { %19 = dma.hbm_to_vmem [thread:$0]  %s260_s0, 128, %s14_s7, [#allocation3], %s217_s16, %s217_s16, %s218_s17  }
  0x12   :  { %212 = dma.done.wait [#allocation3], 128  }
  0x13   :  { %213 = vsyncadd [#allocation3], 4294967168  ;;  %v219_v0 = vmov 0.0   ;;  %vm220_vm0 = vmmov 0   ;;  %v158_v1 = vld [vmem:[#allocation2] sm:$0xff]   ;;  %vm88_vm1 = vcmask 130048  }
  0x14   :  { %146 = vmatprep.subr.bf16.mxu0 %v219_v0  ;;  %148 = vmatprep.mubr.msk.bf16.mxu0 %vm220_vm0, %v219_v0  ;;  %v159_v2 = vld [vmem:[#allocation2] sm:$0xff]   ;;  %s221_s0 = smov [#allocation5]   ;;  %vm123_vm2 = vcmask 122880  }
  0x15   :  { %147 = vmatpush3.bf16.xpose.msra.mxu0 %v158_v1  ;;  %s131_s20 = sshll.u32 %s221_s0, 4  ;;  %s132_s20 = int_to_ptr.vmem [resolvable:$true] %s131_s20 }
  0x16   :  { %s190_s21 = scalar_lea.vmem %s132_s20, 16  ;;  %s194_s22 = scalar_lea.vmem %s132_s20, 32 }
  0x17   :  { %p191_p8 = scmp.ne.s32.totalorder %s132_s20, %s190_s21  ;;  %p195_p9 = scmp.lt.s32.totalorder %s132_s20, %s132_s20 }
  0x18   :  { %p196_p10 = scmp.lt.s32.totalorder %s194_s22, %s190_s21 }
  0x1a   :  { %p197_p11 = por %p196_p10, %p195_p9 }
  0x1c   :  { %149 = vmatmul.mubr.bf16.vlgmr.msra.gmra.mrb[0].mxu0 %v159_v2  ;;  %p198_p12 = pnand %p197_p11, %p191_p8 }
  0xef   :  { %v79_v3 = vpop.f32.mrb[0].mxu0 }
  0xf0   :  { %v86_v4 = vmul.f32 2.0, %v79_v3  ;;  %v150_v5 = vpop.f32.mrb[1].mxu0 }
  0xf1   :  { %v82_v6 = vpop.f32.mrb[2].mxu0 }
  0xf2   :  { %v87_v7 = vmul.f32 2.0, %v82_v6  ;;  %v151_v8 = vpop.f32.mrb[3].mxu0  ;;  %v89_v9 = vsel %vm88_vm1, %v86_v4, -inf }
  0xf4   :  { %v90_v10 = vsel %vm88_vm1, %v87_v7, -inf }
  0xf5   :  { %v91_v11 = vmax.f32 %v89_v9, %v90_v10 }
  0xf7   :  { %v92_v12 = vrot.slane %v91_v11, 4 }
  0xf9   :  { %v93_v13 = vmax.f32 %v91_v11, %v92_v12 }
  0xfb   :  { %v94_v14 = vrot.slane %v93_v13, 2 }
  0xfd   :  { %v95_v15 = vmax.f32 %v93_v13, %v94_v14 }
  0xff   :  { %v96_v16 = vrot.slane %v95_v15, 1 }
 0x101   :  { %v97_v17 = vmax.f32 %v95_v15, %v96_v16 }
 0x103   :  { %v98_v18 = vmax.f32 %v97_v17, -1e+30 }
 0x105   :  { %v99_v19 = vsub.f32 %v86_v4, %v98_v18  ;;  %v100_v20 = vsub.f32 %v87_v7, %v98_v18  ;;  %v105_v23 = vsub.f32 -1e+30, %v98_v18 }
 0x107   :  { %v101_v21 = vmul.f32 1.442695, %v99_v19  ;;  %v103_v22 = vmul.f32 1.442695, %v100_v20  ;;  %v106_v24 = vmul.f32 1.442695, %v105_v23 }
 0x109   :  { %160 = vpow2.f32 %v101_v21 }
 0x10a   :  { %162 = vpow2.f32 %v103_v22 }
 0x10b   :  { %164 = vpow2.f32 %v106_v24 }
 0x113   :  { %v161_v25 = vpop.eup %160 }
 0x114   :  { %v163_v26 = vpop.eup %162  ;;  %v109_v27 = vsel %vm88_vm1, %v161_v25, 0.0 }
 0x115   :  { %v110_v28 = vsel %vm88_vm1, %v163_v26, 0.0  ;;  %v165_v34 = vpop.eup %164 }
 0x116   :  { %v111_v29 = vadd.f32 %v110_v28, %v109_v27  ;;  %v108_v36 = vmul.f32 0.0, %v165_v34 }
 0x118   :  { %v112_v30 = vrot.slane %v111_v29, 4 }
 0x11a   :  { %v113_v31 = vadd.f32 %v112_v30, %v111_v29 }
 0x11c   :  { %v114_v32 = vrot.slane %v113_v31, 2 }
 0x11e   :  { %v115_v33 = vadd.f32 %v114_v32, %v113_v31 }
 0x120   :  { %v116_v35 = vrot.slane %v115_v33, 1 }
 0x122   :  { %v117_v37 = vadd.f32 %v116_v35, %v115_v33 }
 0x124   :  { %v118_v38 = vadd.f32 %v117_v37, %v108_v36 }
 0x126   :  { %166 = vlog2.f32 %v118_v38 }
 0x130   :  { %v167_v39 = vpop.eup %166 }
 0x131   :  { %v120_v40 = vmul.f32 0.6931472, %v167_v39 }
 0x133   :  { %v121_v41 = vadd.f32 %v120_v40, %v98_v18 }
 0x135   :  { %v122_v42 = vsub.f32 %v121_v41, %v86_v4 }
 0x137   :  { %124 = vst.msk [vmem:[#allocation5] sm:$0x1] %vm123_vm2, %v122_v42 }
 0x138   :  { %201 = shalt.err (!%p198_p12)
}
 0x139   :  { %s202_s25 = scalar_lea.hbm %s261_s1, 16 }
 0x13a   :  { %p203_p13 = scmp.ne.s32.totalorder %s261_s1, %s202_s25  ;;  %p206_p0 = scmp.lt.u32.totalorder %s202_s25, %s261_s1 }
 0x13c   :  { %p208_p1 = pnand %p206_p0, %p203_p13 }
 0x13e   :  { %211 = shalt.err (!%p208_p1)
}
 0x13f   :  { %134 = dma.vmem_to_hbm [thread:$0]  %s132_s20, 16, %s261_s1, [#allocation4]  }
 0x140   :  { %214 = dma.done.wait [#allocation4], 16  }
 0x141   :  { %215 = vsyncadd [#allocation4], 4294967280 }
 0x142   :  { %138 = vsyncpa [#allocation3], 1 }
 0x143   :  { %139 = vsyncpa [#allocation4], 1 }

</bundles_post_ra>
